<compile_context>
chip_gen: v5e
topology: v5e:2x2
jax: 0.10.0
libtpu: 0.0.40
codegen_flags: <defaults>
</compile_context>

<pallas_src>
import functools
import math

import jax
import jax.numpy as jnp
from jax.experimental import pallas as pl
from jax.experimental.pallas import tpu as pltpu


def _lora_linear_kernel(x_ref, w_org_ref, b_ref, w_down_ref, w_up_ref, o_ref,
                        *, lora_scale):
    # x_ref:      (TM, IN)   tile of flattened input rows
    # w_org_ref:  (IN, TN)   original Linear weight (transposed), OUT-tile
    # b_ref:      (1,  TN)   original Linear bias, OUT-tile
    # w_down_ref: (IN, R)    lora_down weight (transposed), whole
    # w_up_ref:   (R,  TN)   lora_up weight (transposed), OUT-tile
    # o_ref:      (TM, TN)
    x = x_ref[...]

    # Original Linear path: x @ W_org^T + b   (f32 accumulate on the MXU).
    y = jnp.dot(x, w_org_ref[...], preferred_element_type=jnp.float32)
    y = y + b_ref[...].astype(jnp.float32)

    # LoRA path: ((x @ W_down^T) @ W_up^T) * (multiplier * scale).
    # All-f32 intermediates; R is tiny so the f32 up-projection is negligible.
    d = jnp.dot(x, w_down_ref[...], preferred_element_type=jnp.float32)
    u = jnp.dot(d, w_up_ref[...].astype(jnp.float32),
                preferred_element_type=jnp.float32)

    o_ref[...] = (y + u * lora_scale).astype(o_ref.dtype)


def prepare_lora_linear_params(w_org, b_org, w_down, w_up):
    """Convert PyTorch-layout LoRA/Linear weights to kernel layout.

    w_org (OUT, IN), b_org (OUT,), w_down (R, IN), w_up (OUT, R)
      -> w_org_t (IN, OUT), b2 (1, OUT), w_down_t (IN, R), w_up_t (R, OUT)

    Call ONCE and cache the result: transposing per forward call is a full
    HBM read+write of the weights, comparable to the kernel's own traffic.
    """
    return w_org.T, b_org.reshape(1, -1), w_down.T, w_up.T


def _pick_out_tile(out_dim, tn):
    """Largest OUT tile <= tn that is a multiple of 128 and divides OUT;
    fall back to the full OUT dim when it is not lane-aligned (always legal)."""
    if out_dim % tn == 0:
        return tn
    if out_dim % 128 == 0:
        for cand in range(min(tn, out_dim), 0, -128):
            if out_dim % cand == 0:
                return cand
    return out_dim


def lora_linear_forward(x, w_org_t, b2, w_down_t, w_up_t, multiplier, scale,
                        *, tm=256, tn=256, vmem_limit_bytes=None):
    """x: (B, S, IN). Weights in *kernel* layout (see prepare_lora_linear_params):
       w_org_t (IN, OUT), b2 (1, OUT), w_down_t (IN, R), w_up_t (R, OUT).

    tm: row tile (multiple of 8; 256 default, use 512 when VMEM allows).
    tn: OUT tile (multiple of 128; 256 default)."""
    B, S, IN = x.shape
    OUT = w_org_t.shape[1]
    R = w_down_t.shape[1]
    M = B * S

    # Row tile: multiple of 8 sublanes, capped at the (8-padded) row count.
    tm = max(8, (tm // 8) * 8)
    tm_eff = min(tm, pl.cdiv(M, 8) * 8)
    M_pad = pl.cdiv(M, tm_eff) * tm_eff

    # OUT tile: multiple of 128 lanes (or full OUT when it is not aligned).
    tn = max(128, (tn // 128) * 128)
    tn_eff = _pick_out_tile(OUT, tn)

    x2 = x.reshape(M, IN)
    if M_pad != M:
        x2 = jnp.pad(x2, ((0, M_pad - M), (0, 0)))

    kernel = functools.partial(_lora_linear_kernel,
                               lora_scale=float(multiplier) * float(scale))

    out2 = pl.pallas_call(
        kernel,
        out_shape=jax.ShapeDtypeStruct((M_pad, OUT), x.dtype),
        grid=(M_pad // tm_eff, OUT // tn_eff),
        in_specs=[
            pl.BlockSpec((tm_eff, IN), lambda i, j: (i, 0)),   # x row tile
            pl.BlockSpec((IN, tn_eff), lambda i, j: (0, j)),   # W_org^T OUT tile
            pl.BlockSpec((1, tn_eff), lambda i, j: (0, j)),    # bias OUT tile
            pl.BlockSpec((IN, R), lambda i, j: (0, 0)),        # W_down^T (whole)
            pl.BlockSpec((R, tn_eff), lambda i, j: (0, j)),    # W_up^T OUT tile
        ],
        out_specs=pl.BlockSpec((tm_eff, tn_eff), lambda i, j: (i, j)),
        compiler_params=pltpu.CompilerParams(
            dimension_semantics=("parallel", "parallel"),
            vmem_limit_bytes=vmem_limit_bytes),
    )(x2, w_org_t, b2, w_down_t, w_up_t)

    if M_pad != M:
        out2 = out2[:M]
    return out2.reshape(B, S, OUT)


def _reference(x, w_org, b_org, w_down, w_up, multiplier, scale):
    B, S, IN = x.shape
    OUT = w_org.shape[0]
    x2 = x.reshape(B * S, IN)
    return (x2 @ w_org.T + b_org[None, :]
            + (x2 @ w_down.T) @ w_up.T * multiplier * scale).reshape(B, S, OUT)


if __name__ == "__main__":
    # Small shapes consistent with a Linear-wrapped LoRA module.
    IN, OUT, R = 32, 32, 4
    multiplier = 1.0
    alpha = 1.0
    scale = alpha / R  # = alpha / lora_dim

    key = jax.random.PRNGKey(0)
    kx, ko, kb, kd, ku, kx2 = jax.random.split(key, 6)

    # Original Linear parameters (deterministic synthetic values).
    w_org = jax.random.normal(ko, (OUT, IN), dtype=jnp.float32) * 0.05
    b_org = jax.random.normal(kb, (OUT,), dtype=jnp.float32) * 0.01

    # lora_down: kaiming_uniform_(a=sqrt(5)) -> U(-1/sqrt(fan_in), 1/sqrt(fan_in))
    bound = 1.0 / math.sqrt(IN)
    w_down = jax.random.uniform(kd, (R, IN), dtype=jnp.float32,
                                minval=-bound, maxval=bound)
    # Module inits lora_up to zeros; use small deterministic nonzero values here
    # so the LoRA path in the kernel is actually exercised.
    w_up = jax.random.normal(ku, (OUT, R), dtype=jnp.float32) * 0.02

    # One-time weight layout conversion (cache this in real use).
    w_org_t, b2, w_down_t, w_up_t = prepare_lora_linear_params(
        w_org, b_org, w_down, w_up)

    # Case 1: batch=2, seq=8 (M divisible by 8).
    x = jax.random.normal(kx, (2, 8, IN), dtype=jnp.float32)
    out = lora_linear_forward(x, w_org_t, b2, w_down_t, w_up_t,
                              multiplier, scale)
    out = jax.block_until_ready(out)
    ref = _reference(x, w_org, b_org, w_down, w_up, multiplier, scale)
    assert out.shape == (2, 8, OUT)
    assert jnp.allclose(out, ref, atol=1e-5, rtol=1e-5), "mismatch (case 1)"

    # Case 2: ragged row count (batch=1, seq=13) -> exercises M padding path.
    xr = jax.random.normal(kx2, (1, 13, IN), dtype=jnp.float32)
    out_r = lora_linear_forward(xr, w_org_t, b2, w_down_t, w_up_t,
                                multiplier, scale)
    out_r = jax.block_until_ready(out_r)
    ref_r = _reference(xr, w_org, b_org, w_down, w_up, multiplier, scale)
    assert out_r.shape == (1, 13, OUT)
    assert jnp.allclose(out_r, ref_r, atol=1e-5, rtol=1e-5), "mismatch (case 2)"

    print("KERNEL_OK")
</pallas_src>

<mosaic_0001>
module attributes {stable_mosaic.version = 11 : i64} {
  func.func @_lora_linear_kernel(%arg0: i32, %arg1: i32, %arg2: memref<16x32xf32, #tpu.memory_space<vmem>>, %arg3: memref<32x32xf32, #tpu.memory_space<vmem>>, %arg4: memref<1x32xf32, #tpu.memory_space<vmem>>, %arg5: memref<32x4xf32, #tpu.memory_space<vmem>>, %arg6: memref<4x32xf32, #tpu.memory_space<vmem>>, %arg7: memref<16x32xf32, #tpu.memory_space<vmem>>) attributes {dimension_semantics = [#tpu.dimension_semantics<parallel>, #tpu.dimension_semantics<parallel>], iteration_bounds = array<i64: 1, 1>, scalar_prefetch = 0 : i64, scratch_operands = 0 : i64, tpu.core_type = #tpu.core_type<tc>, window_params = [{transform_indices = @transform_0, window_bounds = array<i64: 16, 32>}, {transform_indices = @transform_1, window_bounds = array<i64: 32, 32>}, {transform_indices = @transform_2, window_bounds = array<i64: 1, 32>}, {pipeline_mode = #tpu.pipeline_mode<synchronous>, transform_indices = @transform_3, window_bounds = array<i64: 32, 4>}, {transform_indices = @transform_4, window_bounds = array<i64: 4, 32>}, {transform_indices = @transform_5, window_bounds = array<i64: 16, 32>}]} {
    %c0 = arith.constant 0 : index
    %c0_0 = arith.constant 0 : index
    %0 = vector.load %arg2[%c0, %c0_0] : memref<16x32xf32, #tpu.memory_space<vmem>>, vector<16x32xf32>
    %c0_1 = arith.constant 0 : index
    %c0_2 = arith.constant 0 : index
    %1 = vector.load %arg3[%c0_1, %c0_2] : memref<32x32xf32, #tpu.memory_space<vmem>>, vector<32x32xf32>
    %cst = arith.constant dense<0.000000e+00> : vector<16x32xf32>
    %2 = tpu.matmul %0, %1, %cst {dimension_numbers = #tpu.dot_dimension_numbers<[1], [0], [0], [1], [0, 0, 1, 1], [], []>} : vector<16x32xf32>, vector<32x32xf32>, vector<16x32xf32> -> vector<16x32xf32>
    %c0_3 = arith.constant 0 : index
    %c0_4 = arith.constant 0 : index
    %3 = vector.load %arg4[%c0_3, %c0_4] : memref<1x32xf32, #tpu.memory_space<vmem>>, vector<1x32xf32>
    %4 = vector.broadcast %3 : vector<1x32xf32> to vector<16x32xf32>
    %5 = arith.addf %2, %4 : vector<16x32xf32>
    %c0_5 = arith.constant 0 : index
    %c0_6 = arith.constant 0 : index
    %6 = vector.load %arg5[%c0_5, %c0_6] : memref<32x4xf32, #tpu.memory_space<vmem>>, vector<32x4xf32>
    %cst_7 = arith.constant dense<0.000000e+00> : vector<16x4xf32>
    %7 = tpu.matmul %0, %6, %cst_7 {dimension_numbers = #tpu.dot_dimension_numbers<[1], [0], [0], [1], [0, 0, 1, 1], [], []>} : vector<16x32xf32>, vector<32x4xf32>, vector<16x4xf32> -> vector<16x4xf32>
    %c0_8 = arith.constant 0 : index
    %c0_9 = arith.constant 0 : index
    %8 = vector.load %arg6[%c0_8, %c0_9] : memref<4x32xf32, #tpu.memory_space<vmem>>, vector<4x32xf32>
    %cst_10 = arith.constant dense<0.000000e+00> : vector<16x32xf32>
    %9 = tpu.matmul %7, %8, %cst_10 {dimension_numbers = #tpu.dot_dimension_numbers<[1], [0], [0], [1], [0, 0, 1, 1], [], []>} : vector<16x4xf32>, vector<4x32xf32>, vector<16x32xf32> -> vector<16x32xf32>
    %cst_11 = arith.constant 2.500000e-01 : f32
    %10 = vector.broadcast %cst_11 : f32 to vector<16x32xf32>
    %11 = arith.mulf %9, %10 : vector<16x32xf32>
    %12 = arith.addf %5, %11 : vector<16x32xf32>
    %c0_12 = arith.constant 0 : index
    %c0_13 = arith.constant 0 : index
    %13 = vector.load %arg7[%c0_12, %c0_13] : memref<16x32xf32, #tpu.memory_space<vmem>>, vector<16x32xf32>
    tpu.vector_store %arg7[%c0_12, %c0_13], %12 {strides = array<i32>} : memref<16x32xf32, #tpu.memory_space<vmem>>, vector<16x32xf32>,
    return
  }
  func.func @transform_0(%arg0: i32, %arg1: i32) -> (i32, i32) {
    %c0_i32 = arith.constant 0 : i32
    %c0_i32_0 = arith.constant 0 : i32
    return %arg0, %c0_i32 : i32, i32
  }
  func.func @transform_1(%arg0: i32, %arg1: i32) -> (i32, i32) {
    %c0_i32 = arith.constant 0 : i32
    %c0_i32_0 = arith.constant 0 : i32
    return %c0_i32, %arg1 : i32, i32
  }
  func.func @transform_2(%arg0: i32, %arg1: i32) -> (i32, i32) {
    %c0_i32 = arith.constant 0 : i32
    %c0_i32_0 = arith.constant 0 : i32
    return %c0_i32, %arg1 : i32, i32
  }
  func.func @transform_3(%arg0: i32, %arg1: i32) -> (i32, i32) {
    %c0_i32 = arith.constant 0 : i32
    %c0_i32_0 = arith.constant 0 : i32
    %c0_i32_1 = arith.constant 0 : i32
    return %c0_i32, %c0_i32_0 : i32, i32
  }
  func.func @transform_4(%arg0: i32, %arg1: i32) -> (i32, i32) {
    %c0_i32 = arith.constant 0 : i32
    %c0_i32_0 = arith.constant 0 : i32
    return %c0_i32, %arg1 : i32, i32
  }
  func.func @transform_5(%arg0: i32, %arg1: i32) -> (i32, i32) {
    %c0_i32 = arith.constant 0 : i32
    return %arg0, %arg1 : i32, i32
  }
}

</mosaic_0001>

<bundles_post_ra>
// kernel: tpu_custom_call.1
= control target key start
LH: loop header
LB: loop body
LE: loop exit
PB: predicated region body
PF: predicated region fallthrough
CT: control target
= control target key end

     0   :  { %10 = vsyncpa [#allocation3], 0  ;;  %s314_s0 = inlined_call_operand.hbm [shape: f32[16,32], index: 0, kind: input, shape index: {}]   ;;  %s315_s1 = inlined_call_operand.vmem [shape: f32[32,32], index: 1, kind: input, shape index: {}]   ;;  %s316_s2 = inlined_call_operand.vmem [shape: f32[1,32], index: 2, kind: input, shape index: {}]   ;;  %s317_s3 = inlined_call_operand.vmem [shape: f32[32,4], index: 3, kind: input, shape index: {}]   ;;  %s318_s4 = inlined_call_operand.vmem [shape: f32[4,32], index: 4, kind: input, shape index: {}]   ;;  %s319_s5 = inlined_call_operand.hbm [shape: f32[16,32], index: 5, kind: output, shape index: {}]  }
   0x1   :  { %11 = vsyncpa [#allocation4], 0  ;;  %s16_s20 = sshll.u32 %s314_s0, 4  ;;  %s232_s21 = smov [#allocation2]   ;;  %s17_s20 = int_to_ptr.hbm [resolvable:$true] %s16_s20 }
   0x2   :  { %s18_s22 = sshll.u32 %s232_s21, 4  ;;  %s233_s23 = smov 128   ;;  %s19_s22 = int_to_ptr.vmem [resolvable:$true] %s18_s22 }
   0x3   :  { %s234_s24 = smov 8  }
   0x4   :  { %24 = dma.hbm_to_vmem [thread:$0]  %s17_s20, 256, %s19_s22, [#allocation3], %s233_s23, %s233_s23, %s234_s24  }
   0x5   :  { %228 = dma.done.wait [#allocation3], 256  }
   0x6   :  { %229 = vsyncadd [#allocation3], 4294967040  ;;  %v80_v0 = vld [vmem:[%s317_s3 + $0x18] sm:$0xff]  ;;  %v79_v1 = vld [vmem:[%s317_s3 + $0x10] sm:$0xff]  ;;  %vm47_vm0 = vcmask 261120   ;;  %vm112_vm1 = vcmask 1043456  }
   0x7   :  { %93 = vmatpush.msra.mxu1 %v80_v0  ;;  %v78_v2 = vld [vmem:[%s317_s3 + $0x8] sm:$0xff]  ;;  %v42_v3 = vld [vmem:[%s315_s1 + $0x18] sm:$0xff]  ;;  %v77_v4 = vld [vmem:[%s317_s3] sm:$0xff]  ;;  %vm105_vm2 = vcmask 31744   ;;  %s151_s20 = sshll.u32 %s319_s5, 4  ;;  %s152_s20 = int_to_ptr.hbm [resolvable:$true] %s151_s20 }
   0x8   :  { %66 = vmatpush.msra.mxu0 %v42_v3  ;;  %171 = vmatpush.msra.mxu3 %v42_v3  ;;  %v37_v5 = vld [vmem:[#allocation2] sm:$0xff]  ;;  %v38_v6 = vld [vmem:[#allocation2 + $0x8] sm:$0xff]  ;;  %v41_v8 = vld [vmem:[%s315_s1 + $0x10] sm:$0xff] }
   0x9   :  { %94 = vmatpush.msra.mxu1 %v79_v1  ;;  %v104_v7 = vld [vmem:[%s318_s4] sm:$0xf]  ;;  %v40_v9 = vld [vmem:[%s315_s1 + $0x8] sm:$0xff] }
   0xa   :  { %168 = vmatpush.msk.msra.mxu2 %vm112_vm1, %v104_v7  ;;  %67 = vmatpush.msra.mxu0 %v41_v8  ;;  %v39_v10 = vld [vmem:[%s315_s1] sm:$0xff]  ;;  %s235_s1 = smov [#allocation5]  }
   0xb   :  { %95 = vmatpush.msra.mxu1 %v78_v2  ;;  %172 = vmatpush.msra.mxu3 %v41_v8  ;;  %v179_v13 = vld [vmem:[%s316_s2] ss:$0 sm:$0xff]  ;;  %s149_s17 = sshll.u32 %s235_s1, 4  ;;  %s150_s17 = int_to_ptr.vmem [resolvable:$true] %s149_s17 }
   0xc   :  { %68 = vmatpush.msra.mxu0 %v40_v9 }
   0xd   :  { %96 = vmatpush.msra.mxu1 %v77_v4  ;;  %173 = vmatpush.msra.mxu3 %v40_v9 }
   0xe   :  { %166 = vmatmul.msk.f32.vlgmr.msra.gmra.mxu1 %vm47_vm0, %v37_v5  ;;  %69 = vmatpush.msra.mxu0 %v39_v10 }
   0xf   :  { %174 = vmatpush.msra.mxu3 %v39_v10  ;;  %164 = vmatmul.msk.f32.vlgmr.msra.gmra.mxu0 %vm47_vm0, %v37_v5 }
  0x10   :  { %165 = vmatmul.msk.f32.vlgmr.msra.gmra.mxu3 %vm47_vm0, %v38_v6 }
  0x16   :  { %167 = vmatmul.msk.f32.gmra.mxu1 %vm47_vm0, %v38_v6 }
  0x8b   :  { %v98_v11 = vpop.f32.mrf.mxu1 }
  0x8c   :  { %169 = vmatmul.msk.f32.vlgmr.msra.gmra.mxu2 %vm105_vm2, %v98_v11  ;;  %v71_v14 = vpop.f32.mrf.mxu0 }
  0x8d   :  { %v72_v15 = vadd.f32 %v179_v13, %v71_v14 }
  0x93   :  { %v101_v12 = vpop.f32.mrf.mxu1  ;;  %v74_v19 = vpop.f32.mrf.mxu3 }
  0x94   :  { %170 = vmatmul.msk.f32.gmra.mxu2 %vm105_vm2, %v101_v12  ;;  %v75_v20 = vadd.f32 %v179_v13, %v74_v19 }
 0x10f   :  { %v133_v16 = vpop.f32.mrf.mxu2 }
 0x110   :  { %v139_v17 = vmul.f32 0.25, %v133_v16 }
 0x112   :  { %v141_v18 = vadd.f32 %v139_v17, %v72_v15 }
 0x114   :  { %143 = vst.msk [vmem:[#allocation5] sm:$0xff] %vm47_vm0, %v141_v18 }
 0x117   :  { %v136_v21 = vpop.f32.mrf.mxu2 }
 0x118   :  { %v140_v22 = vmul.f32 0.25, %v136_v21 }
 0x11a   :  { %v142_v23 = vadd.f32 %v140_v22, %v75_v20 }
 0x11c   :  { %144 = vst.msk [vmem:[#allocation5 + $0x8] sm:$0xff] %vm47_vm0, %v142_v23 }
 0x11d   :  { %157 = dma.vmem_to_hbm [thread:$0]  %s150_s17, 256, %s152_s20, [#allocation4], %s233_s23, %s233_s23, %s234_s24  }
 0x11e   :  { %230 = dma.done.wait [#allocation4], 256  }
 0x11f   :  { %231 = vsyncadd [#allocation4], 4294967040 }
 0x120   :  { %162 = vsyncpa [#allocation3], 1 }
 0x121   :  { %163 = vsyncpa [#allocation4], 1 }

</bundles_post_ra>
